<compile_context>
chip_gen: v7x
topology: tpu7x:2x2x1
jax: 0.10.0
libtpu: 0.0.40
codegen_flags: <defaults>
</compile_context>

<pallas_src>
import jax
import jax.numpy as jnp
from jax.experimental import pallas as pl
from jax.experimental.pallas import tpu as pltpu

IN_FEATURES = 8
H1 = 64
H2 = 32
LANE = 128

P_ROWS = 80          # 8 (w1) + 64 (w2) + 4 vector rows + 4 pad -> multiple of 8
P_COLS = 128         # one lane tile

# Row offsets inside the packed parameter slab.
_R_W1 = 0            # rows 0:8
_R_W2 = 8            # rows 8:72
_R_B1 = 72
_R_B2 = 73
_R_B3 = 74
_R_W3 = 75


def _round_up(n, m):
    return ((n + m - 1) // m) * m


def _cdiv(a, b):
    return -(-a // b)


def mlp_kernel(x_ref, p_ref, o_ref):
    x = x_ref[...]                                   # (bb, 8)  f32

    # Static, sublane-aligned slices of the packed parameter slab.
    w1 = p_ref[_R_W1:_R_W1 + IN_FEATURES, 0:H1]      # (8, 64)
    w2 = p_ref[_R_W2:_R_W2 + H1, 0:H2]               # (64, 32)
    b1 = p_ref[_R_B1:_R_B1 + 1, 0:H1]                # (1, 64)
    b2 = p_ref[_R_B2:_R_B2 + 1, 0:H2]                # (1, 32)
    b3 = p_ref[_R_B3:_R_B3 + 1, 0:1]                 # (1, 1)
    w3 = p_ref[_R_W3:_R_W3 + 1, 0:H2]                # (1, 32) fc3 weight row

    # fc1 + ReLU (MXU, f32 accumulate)
    h1 = jnp.maximum(jnp.dot(x, w1, preferred_element_type=jnp.float32) + b1, 0.0)

    # fc2 + ReLU (MXU, f32 accumulate)
    h2 = jnp.maximum(jnp.dot(h1, w2, preferred_element_type=jnp.float32) + b2, 0.0)

    # fc3: N=1 output -> VPU multiply + cross-lane reduce (skip the MXU).
    h3 = jnp.sum(h2 * w3, axis=-1, keepdims=True) + b3        # (bb, 1)

    # Compact, lane-dense store: relayout the (bb,1) column of per-row scalars
    # into a (bb/128, 128) slab -> full-lane unmasked vst, 4 B/row writeback.
    o_ref[...] = jnp.reshape(h3, o_ref.shape).astype(o_ref.dtype)


def mlp_forward(x, p_slab, *, block_b=1024):
    """x: (B, 8) f32, p_slab: (80, 128) packed params -> (B, 1) f32."""
    B, F = x.shape
    assert F == IN_FEATURES
    assert p_slab.shape == (P_ROWS, P_COLS)

    # Batch tile: multiple of 128 (needed for the compact (bb/128,128) store).
    B128 = _round_up(B, LANE)
    bb = min(_round_up(block_b, LANE), B128)
    # v7x: expose >= 2 grid steps so the "parallel" axis shards over both TCs.
    if B128 // bb < 2 and B128 >= 2 * LANE:
        bb = _round_up(_cdiv(B128, 2), LANE)
    Bp = _round_up(B, bb)                 # minimal padding: Bp - B < bb

    if Bp != B:
        x = jnp.pad(x, ((0, Bp - B), (0, 0)))

    out = pl.pallas_call(
        mlp_kernel,
        out_shape=jax.ShapeDtypeStruct((Bp // LANE, LANE), jnp.float32),
        grid=(Bp // bb,),
        in_specs=[
            pl.BlockSpec((bb, F), lambda i: (i, 0)),           # x tiled over batch
            pl.BlockSpec((P_ROWS, P_COLS), lambda i: (0, 0)),  # params VMEM-resident
        ],
        out_specs=pl.BlockSpec((bb // LANE, LANE), lambda i: (i, 0)),
        compiler_params=pltpu.CompilerParams(
            dimension_semantics=("parallel",)),
    )(x, p_slab)

    # Row-major reshape is the inverse of the in-kernel relayout; the slice is
    # B*4 bytes, not a re-read of a wide padded slab.
    return out.reshape(Bp, 1)[:B]


def init_params(key):
    """Deterministic init mirroring nn.Linear shapes (weights stored as (in, out))."""
    def linear(key, fan_in, fan_out):
        kw, kb = jax.random.split(key)
        bound = 1.0 / jnp.sqrt(fan_in)
        w = jax.random.uniform(kw, (fan_in, fan_out), jnp.float32, -bound, bound)
        b = jax.random.uniform(kb, (fan_out,), jnp.float32, -bound, bound)
        return w, b

    k1, k2, k3 = jax.random.split(key, 3)
    w1, b1 = linear(k1, IN_FEATURES, H1)
    w2, b2 = linear(k2, H1, H2)
    w3, b3 = linear(k3, H2, 1)
    return w1, b1, w2, b2, w3, b3


def pack_params(w1, b1, w2, b2, w3, b3):
    """Pack all layers into a single zero-padded (80, 128) f32 slab (one DMA)."""
    p = jnp.zeros((P_ROWS, P_COLS), jnp.float32)
    p = p.at[_R_W1:_R_W1 + IN_FEATURES, 0:H1].set(w1)
    p = p.at[_R_W2:_R_W2 + H1, 0:H2].set(w2)
    p = p.at[_R_B1, 0:H1].set(b1)
    p = p.at[_R_B2, 0:H2].set(b2)
    p = p.at[_R_B3, 0].set(b3[0])
    p = p.at[_R_W3, 0:H2].set(w3[:, 0])
    return p


if __name__ == "__main__":
    key = jax.random.PRNGKey(0)
    k_params, k_x = jax.random.split(key)

    w1, b1, w2, b2, w3, b3 = init_params(k_params)
    p_slab = pack_params(w1, b1, w2, b2, w3, b3)

    def ref_forward(xx):
        h = jnp.maximum(xx @ w1 + b1, 0.0)
        h = jnp.maximum(h @ w2 + b2, 0.0)
        return h @ w3 + b3

    # Primary small test: batch=8, features=8 (pads to one 128-row tile).
    x = jax.random.normal(k_x, (8, IN_FEATURES), jnp.float32)
    out = jax.block_until_ready(mlp_forward(x, p_slab))
    assert out.shape == (8, 1)
    assert jnp.allclose(out, ref_forward(x), atol=1e-5), "mismatch vs reference (B=8)"

    # Multi-step grid + padding path (B not a multiple of the tile).
    x2 = jax.random.normal(jax.random.PRNGKey(1), (200, IN_FEATURES), jnp.float32)
    out2 = jax.block_until_ready(mlp_forward(x2, p_slab, block_b=128))
    assert out2.shape == (200, 1)
    assert jnp.allclose(out2, ref_forward(x2), atol=1e-5), "mismatch vs reference (B=200)"

    # Default-tile path exercising the >=2-grid-step split (v7x 2-TC sharding).
    x3 = jax.random.normal(jax.random.PRNGKey(2), (300, IN_FEATURES), jnp.float32)
    out3 = jax.block_until_ready(mlp_forward(x3, p_slab))
    assert out3.shape == (300, 1)
    assert jnp.allclose(out3, ref_forward(x3), atol=1e-5), "mismatch vs reference (B=300)"

    print("KERNEL_OK")
</pallas_src>

<mosaic_0001>
module attributes {stable_mosaic.version = 11 : i64} {
  func.func @mlp_kernel(%arg0: i32, %arg1: memref<128x8xf32, #tpu.memory_space<vmem>>, %arg2: memref<80x128xf32, #tpu.memory_space<vmem>>, %arg3: memref<1x128xf32, #tpu.memory_space<vmem>>) attributes {dimension_semantics = [#tpu.dimension_semantics<parallel>], iteration_bounds = array<i64: 1>, scalar_prefetch = 0 : i64, scratch_operands = 0 : i64, tpu.core_type = #tpu.core_type<tc>, window_params = [{transform_indices = @transform_0, window_bounds = array<i64: 128, 8>}, {pipeline_mode = #tpu.pipeline_mode<synchronous>, transform_indices = @transform_1, window_bounds = array<i64: 80, 128>}, {transform_indices = @transform_2, window_bounds = array<i64: 1, 128>}]} {
    %c0 = arith.constant 0 : index
    %c0_0 = arith.constant 0 : index
    %0 = vector.load %arg1[%c0, %c0_0] : memref<128x8xf32, #tpu.memory_space<vmem>>, vector<128x8xf32>
    %c0_1 = arith.constant 0 : index
    %c0_2 = arith.constant 0 : index
    %1 = vector.load %arg2[%c0_1, %c0_2] : memref<80x128xf32, #tpu.memory_space<vmem>>, vector<8x64xf32>
    %c8 = arith.constant 8 : index
    %c0_3 = arith.constant 0 : index
    %2 = vector.load %arg2[%c8, %c0_3] : memref<80x128xf32, #tpu.memory_space<vmem>>, vector<64x32xf32>
    %c72 = arith.constant 72 : index
    %c0_4 = arith.constant 0 : index
    %3 = vector.load %arg2[%c72, %c0_4] : memref<80x128xf32, #tpu.memory_space<vmem>>, vector<1x64xf32>
    %c73 = arith.constant 73 : index
    %c0_5 = arith.constant 0 : index
    %4 = vector.load %arg2[%c73, %c0_5] : memref<80x128xf32, #tpu.memory_space<vmem>>, vector<1x32xf32>
    %c74 = arith.constant 74 : index
    %c0_6 = arith.constant 0 : index
    %5 = vector.load %arg2[%c74, %c0_6] : memref<80x128xf32, #tpu.memory_space<vmem>>, vector<1x1xf32>
    %c75 = arith.constant 75 : index
    %c0_7 = arith.constant 0 : index
    %6 = vector.load %arg2[%c75, %c0_7] : memref<80x128xf32, #tpu.memory_space<vmem>>, vector<1x32xf32>
    %cst = arith.constant dense<0.000000e+00> : vector<128x64xf32>
    %7 = tpu.matmul %0, %1, %cst {dimension_numbers = #tpu.dot_dimension_numbers<[1], [0], [0], [1], [0, 0, 1, 1], [], []>} : vector<128x8xf32>, vector<8x64xf32>, vector<128x64xf32> -> vector<128x64xf32>
    %8 = vector.broadcast %3 : vector<1x64xf32> to vector<128x64xf32>
    %9 = arith.addf %7, %8 : vector<128x64xf32>
    %cst_8 = arith.constant 0.000000e+00 : f32
    %10 = vector.broadcast %cst_8 : f32 to vector<128x64xf32>
    %11 = arith.maximumf %9, %10 : vector<128x64xf32>
    %cst_9 = arith.constant dense<0.000000e+00> : vector<128x32xf32>
    %12 = tpu.matmul %11, %2, %cst_9 {dimension_numbers = #tpu.dot_dimension_numbers<[1], [0], [0], [1], [0, 0, 1, 1], [], []>} : vector<128x64xf32>, vector<64x32xf32>, vector<128x32xf32> -> vector<128x32xf32>
    %13 = vector.broadcast %4 : vector<1x32xf32> to vector<128x32xf32>
    %14 = arith.addf %12, %13 : vector<128x32xf32>
    %cst_10 = arith.constant 0.000000e+00 : f32
    %15 = vector.broadcast %cst_10 : f32 to vector<128x32xf32>
    %16 = arith.maximumf %14, %15 : vector<128x32xf32>
    %17 = vector.broadcast %6 : vector<1x32xf32> to vector<128x32xf32>
    %18 = arith.mulf %16, %17 : vector<128x32xf32>
    %cst_11 = arith.constant dense<0.000000e+00> : vector<128xf32>
    %19 = vector.multi_reduction <add>, %18, %cst_11 [1] : vector<128x32xf32> to vector<128xf32>
    %20 = vector.shape_cast %19 : vector<128xf32> to vector<128x1xf32>
    %21 = vector.broadcast %5 : vector<1x1xf32> to vector<128x1xf32>
    %22 = arith.addf %20, %21 : vector<128x1xf32>
    %23 = vector.shape_cast %22 : vector<128x1xf32> to vector<1x128xf32>
    %c0_12 = arith.constant 0 : index
    %c0_13 = arith.constant 0 : index
    %24 = vector.load %arg3[%c0_12, %c0_13] : memref<1x128xf32, #tpu.memory_space<vmem>>, vector<1x128xf32>
    tpu.vector_store %arg3[%c0_12, %c0_13], %23 {strides = array<i32>} : memref<1x128xf32, #tpu.memory_space<vmem>>, vector<1x128xf32>,
    return
  }
  func.func @transform_0(%arg0: i32) -> (i32, i32) {
    %c0_i32 = arith.constant 0 : i32
    %c0_i32_0 = arith.constant 0 : i32
    return %arg0, %c0_i32 : i32, i32
  }
  func.func @transform_1(%arg0: i32) -> (i32, i32) {
    %c0_i32 = arith.constant 0 : i32
    %c0_i32_0 = arith.constant 0 : i32
    %c0_i32_1 = arith.constant 0 : i32
    return %c0_i32, %c0_i32_0 : i32, i32
  }
  func.func @transform_2(%arg0: i32) -> (i32, i32) {
    %c0_i32 = arith.constant 0 : i32
    %c0_i32_0 = arith.constant 0 : i32
    return %arg0, %c0_i32 : i32, i32
  }
}

</mosaic_0001>

<bundles_post_ra>
// kernel: tpu_custom_call.1
= control target key start
LH: loop header
LB: loop body
LE: loop exit
PB: predicated region body
PF: predicated region fallthrough
CT: control target
= control target key end

     0   :  { %vm45_vm0 = vcmask 64512   ;;  %s1180_s0 = inlined_call_operand.vmem [shape: f32[128,8], index: 0, kind: input, shape index: {}]   ;;  %s1181_s1 = inlined_call_operand.vmem [shape: f32[80,128], index: 1, kind: input, shape index: {}]   ;;  %s1182_s2 = inlined_call_operand.hbm [shape: f32[1,128], index: 2, kind: output, shape index: {}]  }
   0x1   :  { %v28_v0 = vld [vmem:[%s1181_s1] sm:$0xff]  ;;  %v13_v2 = vld [vmem:[%s1180_s0 + $0x8] sm:$0xff]  ;;  %v14_v3 = vld [vmem:[%s1180_s0 + $0x10] sm:$0xff] }
   0x2   :  { %v12_v1 = vld [vmem:[%s1180_s0] sm:$0xff]  ;;  %826 = vmatprep.subr.mxu0 %v28_v0  ;;  %v15_v4 = vld [vmem:[%s1180_s0 + $0x18] sm:$0xff]  ;;  %v29_v6 = vld [vmem:[%s1181_s1 + $0x8] sm:$0xff] }
   0x3   :  { %828 = vmatprep.mubr.msk.f32.mxu0 %vm45_vm0, %v12_v1  ;;  %827 = vmatpush3.msra.mxu0 %v28_v0  ;;  %v16_v5 = vld [vmem:[%s1180_s0 + $0x20] sm:$0xff]  ;;  %v30_v7 = vld [vmem:[%s1181_s1 + $0x10] sm:$0xff]  ;;  %v31_v8 = vld [vmem:[%s1181_s1 + $0x18] sm:$0xff] }
   0x4   :  { %829 = vmatmul.mubr.msk.f32.vlgmr.msra.gmra.mrb[0].mxu0 %vm45_vm0, %v13_v2  ;;  %v32_v9 = vld [vmem:[%s1181_s1 + $0x20] sm:$0xff]  ;;  %v17_v10 = vld [vmem:[%s1180_s0 + $0x28] sm:$0xff]  ;;  %v892_v11 = vpack.c.bf16 %v30_v7, %v29_v6  ;;  %v34_v14 = vld [vmem:[%s1181_s1 + $0x30] sm:$0xff] }
   0x5   :  { %831 = vmatprep.mubr.msk.f32.mxu0 %vm45_vm0, %v14_v3  ;;  %v896_v12 = vpack.c.bf16 %v32_v9, %v31_v8  ;;  %v33_v13 = vld [vmem:[%s1181_s1 + $0x28] sm:$0xff] }
   0x8   :  { %832 = vmatmul.mubr.msk.f32.gmra.mrb[2].mxu0 %vm45_vm0, %v15_v4 }
   0x9   :  { %834 = vmatprep.mubr.msk.f32.mxu0 %vm45_vm0, %v16_v5 }
   0xa   :  { %7 = vsyncpa [#allocation3], 0  ;;  %v18_v15 = vld [vmem:[%s1180_s0 + $0x30] sm:$0xff]  ;;  %893 = vmatprep.subr.bf16.mxu0 %v892_v11  ;;  %908 = vmatprep.subr.bf16.mxu1 %v892_v11  ;;  %v900_v16 = vpack.c.bf16 %v34_v14, %v33_v13  ;;  %v19_v17 = vld [vmem:[%s1180_s0 + $0x38] sm:$0xff]  ;;  %vm259_vm1 = vcmask 523264   ;;  %vm489_vm2 = vcmask 261120  }
   0xb   :  { %895 = vmatpush3.bf16.msra.mxu0 %v892_v11  ;;  %912 = vmatpush3.bf16.msra.mxu1 %v892_v11  ;;  %v35_v18 = vld [vmem:[%s1181_s1 + $0x38] sm:$0xff]  ;;  %v36_v19 = vld [vmem:[%s1181_s1 + $0x40] sm:$0xff]  ;;  %v21_v22 = vld [vmem:[%s1180_s0 + $0x48] sm:$0xff]  ;;  %vm633_vm3 = vcmask 130112   ;;  %vm640_vm4 = vcmask 195712   ;;  %vm647_vm5 = vcmask 261312  }
   0xc   :  { %835 = vmatmul.mubr.msk.f32.gmra.mrb[4].mxu0 %vm45_vm0, %v17_v10  ;;  %897 = vmatprep.subr.bf16.mxu0 %v896_v12  ;;  %v20_v20 = vld [vmem:[%s1180_s0 + $0x40] sm:$0xff]  ;;  %v904_v21 = vpack.c.bf16 %v36_v19, %v35_v18  ;;  %v22_v23 = vld [vmem:[%s1180_s0 + $0x50] sm:$0xff]  ;;  %v23_v24 = vld [vmem:[%s1180_s0 + $0x58] sm:$0xff]  ;;  %vm654_vm6 = vcmask 326912   ;;  %vm661_vm7 = vcmask 392512   ;;  %vm668_vm8 = vcmask 458112  }
   0xd   :  { %837 = vmatprep.mubr.msk.f32.mxu0 %vm45_vm0, %v18_v15  ;;  %909 = vmatprep.subr.bf16.mxu1 %v896_v12  ;;  %v24_v25 = vld [vmem:[%s1180_s0 + $0x60] sm:$0xff]  ;;  %v25_v26 = vld [vmem:[%s1180_s0 + $0x68] sm:$0xff]  ;;  %v26_v27 = vld [vmem:[%s1180_s0 + $0x70] sm:$0xff]  ;;  %vm675_vm9 = vcmask 523712   ;;  %vm682_vm10 = vcmask 589312   ;;  %vm689_vm11 = vcmask 654912  }
   0xe   :  { %v27_v28 = vld [vmem:[%s1180_s0 + $0x78] sm:$0xff]  ;;  %v749_v29 = vld [vmem:[%s1181_s1 + $0x48] ss:$0 sm:$0xff]  ;;  %v1074_v14 = vld [vmem:[%s1181_s1 + $0x49] ss:$0 sm:$0xff]  ;;  %vm696_vm12 = vcmask 720512  }
   0xf   :  { %899 = vmatpush3.bf16.msra.mxu0 %v896_v12  ;;  %913 = vmatpush3.bf16.msra.mxu1 %v896_v12  ;;  %v1081_v19 = vld [vmem:[%s1181_s1 + $0x4b] ss:$0 sm:$0xff]  ;;  %vm703_vm13 = vcmask 786112   ;;  %vm710_vm14 = vcmask 851712   ;;  %vm717_vm15 = vcmask 917312  }
  0x10   :  { %838 = vmatmul.mubr.msk.f32.gmra.mrb[6].mxu0 %vm45_vm0, %v19_v17  ;;  %901 = vmatprep.subr.bf16.mxu0 %v900_v16 }
  0x11   :  { %840 = vmatprep.mubr.msk.f32.mxu0 %vm45_vm0, %v20_v20  ;;  %910 = vmatprep.subr.bf16.mxu1 %v900_v16 }
  0x13   :  { %903 = vmatpush3.bf16.msra.mxu0 %v900_v16  ;;  %914 = vmatpush3.bf16.msra.mxu1 %v900_v16 }
  0x14   :  { %841 = vmatmul.mubr.msk.f32.gmra.mrb[8].mxu0 %vm45_vm0, %v21_v22  ;;  %905 = vmatprep.subr.bf16.mxu0 %v904_v21 }
  0x15   :  { %843 = vmatprep.mubr.msk.f32.mxu0 %vm45_vm0, %v22_v23  ;;  %911 = vmatprep.subr.bf16.mxu1 %v904_v21 }
  0x17   :  { %907 = vmatpush3.bf16.msra.mxu0 %v904_v21  ;;  %915 = vmatpush3.bf16.msra.mxu1 %v904_v21 }
  0x18   :  { %844 = vmatmul.mubr.msk.f32.gmra.mrb[10].mxu0 %vm45_vm0, %v23_v24 }
  0x19   :  { %846 = vmatprep.mubr.msk.f32.mxu0 %vm45_vm0, %v24_v25 }
  0x1c   :  { %847 = vmatmul.mubr.msk.f32.gmra.mrb[12].mxu0 %vm45_vm0, %v25_v26 }
  0x1d   :  { %849 = vmatprep.mubr.msk.f32.mxu0 %vm45_vm0, %v26_v27 }
  0x20   :  { %850 = vmatmul.mubr.msk.f32.gmra.mrb[14].mxu0 %vm45_vm0, %v27_v28  ;;  %vm724_vm0 = vcmask 982912  }
  0xd7   :  { %v830_v30 = vpop.f32.mrb[0].mxu0 }
  0xd8   :  { %v166_v31 = vadd.f32 %v830_v30, %v749_v29  ;;  %v160_v32 = vpop.f32.mrb[1].mxu0 }
  0xd9   :  { %v161_v33 = vadd.f32 %v749_v29, %v160_v32 }
  0xda   :  { %v240_v36 = vmax.f32 %v166_v31, 0.0 }
  0xdb   :  { %v239_v34 = vmax.f32 %v161_v33, 0.0  ;;  %v833_v35 = vpop.f32.mrb[2].mxu0 }
  0xdc   :  { %v176_v37 = vadd.f32 %v833_v35, %v749_v29  ;;  %v170_v38 = vpop.f32.mrb[3].mxu0 }
  0xdd   :  { %v171_v39 = vadd.f32 %v749_v29, %v170_v38  ;;  %868 = vmatprep.mubr.msk.f32.mxu0 %vm259_vm1, %v239_v34 }
  0xde   :  { %869 = vmatmul.mubr.msk.f32.vlgmr.msra.gmra.mrb[16].mxu0 %vm259_vm1, %v240_v36  ;;  %v242_v42 = vmax.f32 %v176_v37, 0.0 }
  0xdf   :  { %v241_v40 = vmax.f32 %v171_v39, 0.0  ;;  %v836_v41 = vpop.f32.mrb[4].mxu0 }
  0xe0   :  { %v186_v43 = vadd.f32 %v836_v41, %v749_v29  ;;  %v180_v44 = vpop.f32.mrb[5].mxu0 }
  0xe1   :  { %v181_v45 = vadd.f32 %v749_v29, %v180_v44  ;;  %871 = vmatprep.mubr.msk.f32.mxu1 %vm259_vm1, %v241_v40 }
  0xe2   :  { %v244_v46 = vmax.f32 %v186_v43, 0.0  ;;  %872 = vmatmul.mubr.msk.f32.vlgmr.msra.gmra.mrb[0].mxu1 %vm259_vm1, %v242_v42 }
  0xe3   :  { %v243_v47 = vmax.f32 %v181_v45, 0.0  ;;  %v839_v48 = vpop.f32.mrb[6].mxu0 }
  0xe4   :  { %v196_v49 = vadd.f32 %v839_v48, %v749_v29  ;;  %v190_v50 = vpop.f32.mrb[7].mxu0 }
  0xe5   :  { %874 = vmatprep.mubr.msk.f32.mxu1 %vm259_vm1, %v243_v47  ;;  %v191_v51 = vadd.f32 %v749_v29, %v190_v50 }
  0xe6   :  { %v246_v52 = vmax.f32 %v196_v49, 0.0  ;;  %875 = vmatmul.mubr.msk.f32.gmra.mrb[2].mxu1 %vm259_vm1, %v244_v46 }
  0xe7   :  { %v245_v53 = vmax.f32 %v191_v51, 0.0  ;;  %v842_v54 = vpop.f32.mrb[8].mxu0 }
  0xe8   :  { %v206_v55 = vadd.f32 %v842_v54, %v749_v29  ;;  %v200_v56 = vpop.f32.mrb[9].mxu0 }
  0xe9   :  { %v201_v57 = vadd.f32 %v749_v29, %v200_v56  ;;  %877 = vmatprep.mubr.msk.f32.mxu1 %vm259_vm1, %v245_v53 }
  0xea   :  { %v248_v58 = vmax.f32 %v206_v55, 0.0  ;;  %878 = vmatmul.mubr.msk.f32.gmra.mrb[4].mxu1 %vm259_vm1, %v246_v52 }
  0xeb   :  { %v247_v59 = vmax.f32 %v201_v57, 0.0  ;;  %v845_v60 = vpop.f32.mrb[10].mxu0 }
  0xec   :  { %v216_v61 = vadd.f32 %v845_v60, %v749_v29  ;;  %v210_v62 = vpop.f32.mrb[11].mxu0 }
  0xed   :  { %v211_v63 = vadd.f32 %v749_v29, %v210_v62  ;;  %880 = vmatprep.mubr.msk.f32.mxu1 %vm259_vm1, %v247_v59 }
  0xee   :  { %v250_v0 = vmax.f32 %v216_v61, 0.0  ;;  %881 = vmatmul.mubr.msk.f32.gmra.mrb[6].mxu1 %vm259_vm1, %v248_v58 }
  0xef   :  { %v249_v1 = vmax.f32 %v211_v63, 0.0  ;;  %v848_v2 = vpop.f32.mrb[12].mxu0 }
  0xf0   :  { %v226_v3 = vadd.f32 %v848_v2, %v749_v29  ;;  %v220_v4 = vpop.f32.mrb[13].mxu0 }
  0xf1   :  { %v221_v5 = vadd.f32 %v749_v29, %v220_v4  ;;  %883 = vmatprep.mubr.msk.f32.mxu1 %vm259_vm1, %v249_v1 }
  0xf2   :  { %v252_v6 = vmax.f32 %v226_v3, 0.0  ;;  %884 = vmatmul.mubr.msk.f32.gmra.mrb[8].mxu1 %vm259_vm1, %v250_v0 }
  0xf3   :  { %v251_v7 = vmax.f32 %v221_v5, 0.0  ;;  %v851_v8 = vpop.f32.mrb[14].mxu0  ;;  %v944_v5 = vmov 0  }
  0xf4   :  { %v236_v9 = vadd.f32 %v851_v8, %v749_v29  ;;  %v230_v10 = vpop.f32.mrb[15].mxu0  ;;  %918 = vset.pattern.permute.xlu1 %v944_v5  ;;  %919 = vset.pattern.permute.xlu0 %v944_v5 }
  0xf5   :  { %v231_v11 = vadd.f32 %v749_v29, %v230_v10  ;;  %886 = vmatprep.mubr.msk.f32.mxu1 %vm259_vm1, %v251_v7 }
  0xf6   :  { %v254_v12 = vmax.f32 %v236_v9, 0.0  ;;  %887 = vmatmul.mubr.msk.f32.gmra.mrb[10].mxu1 %vm259_vm1, %v252_v6 }
  0xf7   :  { %v253_v13 = vmax.f32 %v231_v11, 0.0 }
  0xf9   :  { %889 = vmatprep.mubr.msk.f32.mxu1 %vm259_vm1, %v253_v13 }
  0xfa   :  { %890 = vmatmul.mubr.msk.f32.gmra.mrb[12].mxu1 %vm259_vm1, %v254_v12  ;;  %vm731_vm1 = vcmask 1048512  }
 0x1b1   :  { %v870_v15 = vpop.f32.mrb[16].mxu0 }
 0x1b2   :  { %v380_v16 = vadd.f32 %v870_v15, %v1074_v14  ;;  %v374_v17 = vpop.f32.mrb[17].mxu0 }
 0x1b3   :  { %v375_v18 = vadd.f32 %v1074_v14, %v374_v17 }
 0x1b4   :  { %v454_v20 = vmax.f32 %v380_v16, 0.0 }
 0x1b5   :  { %v453_v21 = vmax.f32 %v375_v18, 0.0  ;;  %v873_v22 = vpop.f32.mrb[0].mxu1 }
 0x1b6   :  { %v390_v23 = vadd.f32 %v873_v22, %v1074_v14  ;;  %v384_v24 = vpop.f32.mrb[1].mxu1  ;;  %v474_v25 = vmul.f32 %v1081_v19, %v454_v20 }
 0x1b7   :  { %v385_v26 = vadd.f32 %v1074_v14, %v384_v24  ;;  %v473_v29 = vmul.f32 %v1081_v19, %v453_v21 }
 0x1b8   :  { %v456_v27 = vmax.f32 %v390_v23, 0.0  ;;  %v493_v28 = vsel %vm489_vm2, %v474_v25, 0.0 }
 0x1b9   :  { %v455_v30 = vmax.f32 %v385_v26, 0.0  ;;  %494 = vadd.xlane.f32.xlu0 %v493_v28  ;;  %v876_v31 = vpop.f32.mrb[2].mxu1  ;;  %v490_v38 = vsel %vm489_vm2, %v473_v29, 0.0 }
 0x1ba   :  { %v400_v32 = vadd.f32 %v876_v31, %v1074_v14  ;;  %v394_v33 = vpop.f32.mrb[3].mxu1  ;;  %v476_v34 = vmul.f32 %v1081_v19, %v456_v27 }
 0x1bb   :  { %v395_v35 = vadd.f32 %v1074_v14, %v394_v33  ;;  %v475_v39 = vmul.f32 %v1081_v19, %v455_v30 }
 0x1bc   :  { %v458_v36 = vmax.f32 %v400_v32, 0.0  ;;  %v499_v37 = vsel %vm489_vm2, %v476_v34, 0.0 }
 0x1bd   :  { %v457_v40 = vmax.f32 %v395_v35, 0.0  ;;  %500 = vadd.xlane.f32.xlu1 %v499_v37  ;;  %491 = vadd.xlane.f32.xlu0 %v490_v38  ;;  %v879_v41 = vpop.f32.mrb[4].mxu1  ;;  %v496_v47 = vsel %vm489_vm2, %v475_v39, 0.0 }
 0x1be   :  { %v410_v42 = vadd.f32 %v879_v41, %v1074_v14  ;;  %v404_v43 = vpop.f32.mrb[5].mxu1  ;;  %v478_v48 = vmul.f32 %v1081_v19, %v458_v36 }
 0x1bf   :  { %v405_v44 = vadd.f32 %v1074_v14, %v404_v43  ;;  %v477_v45 = vmul.f32 %v1081_v19, %v457_v40 }
 0x1c0   :  { %v460_v46 = vmax.f32 %v410_v42, 0.0  ;;  %v505_v58 = vsel %vm489_vm2, %v478_v48, 0.0 }
 0x1c1   :  { %497 = vadd.xlane.f32.xlu1 %v496_v47  ;;  %v459_v49 = vmax.f32 %v405_v44, 0.0  ;;  %v502_v50 = vsel %vm489_vm2, %v477_v45, 0.0  ;;  %v882_v51 = vpop.f32.mrb[6].mxu1 }
 0x1c2   :  { %503 = vadd.xlane.f32.xlu0 %v502_v50  ;;  %v420_v52 = vadd.f32 %v882_v51, %v1074_v14  ;;  %v414_v53 = vpop.f32.mrb[7].mxu1  ;;  %v480_v54 = vmul.f32 %v1081_v19, %v460_v46 }
 0x1c3   :  { %v415_v55 = vadd.f32 %v1074_v14, %v414_v53  ;;  %v479_v56 = vmul.f32 %v1081_v19, %v459_v49 }
 0x1c4   :  { %v462_v57 = vmax.f32 %v420_v52, 0.0  ;;  %v511_v63 = vsel %vm489_vm2, %v480_v54, 0.0 }
 0x1c5   :  { %506 = vadd.xlane.f32.xlu1 %v505_v58  ;;  %v461_v59 = vmax.f32 %v415_v55, 0.0  ;;  %v885_v60 = vpop.f32.mrb[8].mxu1  ;;  %v508_v61 = vsel %vm489_vm2, %v479_v56, 0.0 }
 0x1c6   :  { %v430_v62 = vadd.f32 %v885_v60, %v1074_v14  ;;  %509 = vadd.xlane.f32.xlu0 %v508_v61  ;;  %v424_v0 = vpop.f32.mrb[9].mxu1  ;;  %v482_v1 = vmul.f32 %v1081_v19, %v462_v57 }
 0x1c7   :  { %v425_v2 = vadd.f32 %v1074_v14, %v424_v0  ;;  %v481_v3 = vmul.f32 %v1081_v19, %v461_v59 }
 0x1c8   :  { %v464_v4 = vmax.f32 %v430_v62, 0.0  ;;  %v517_v10 = vsel %vm489_vm2, %v482_v1, 0.0 }
 0x1c9   :  { %512 = vadd.xlane.f32.xlu1 %v511_v63  ;;  %v463_v6 = vmax.f32 %v425_v2, 0.0  ;;  %v888_v7 = vpop.f32.mrb[10].mxu1  ;;  %v514_v8 = vsel %vm489_vm2, %v481_v3, 0.0  ;;  %v622_v2 = vlaneseq }
 0x1ca   :  { %v440_v9 = vadd.f32 %v888_v7, %v1074_v14  ;;  %v434_v11 = vpop.f32.mrb[11].mxu1  ;;  %v484_v12 = vmul.f32 %v1081_v19, %v464_v4  ;;  %515 = vadd.xlane.f32.xlu0 %v514_v8 }
 0x1cb   :  { %v435_v13 = vadd.f32 %v1074_v14, %v434_v11  ;;  %v483_v15 = vmul.f32 %v1081_v19, %v463_v6  ;;  %v1132_v4 = vand.u32 127, %v622_v2  ;;  %v1135_v7 = vshrl.u32 %v622_v2, 7 }
 0x1cc   :  { %v466_v16 = vmax.f32 %v440_v9, 0.0  ;;  %v523_v22 = vsel %vm489_vm2, %v484_v12, 0.0 }
 0x1cd   :  { %518 = vadd.xlane.f32.xlu1 %v517_v10  ;;  %v465_v17 = vmax.f32 %v435_v13, 0.0  ;;  %v891_v18 = vpop.f32.mrb[12].mxu1  ;;  %v520_v20 = vsel %vm489_vm2, %v483_v15, 0.0  ;;  %v635_v6 = vadd.s32 4294967280, %v1132_v4  ;;  %v628_v8 = vadd.s32 4294967288, %v1132_v4 }
 0x1ce   :  { %v450_v21 = vadd.f32 %v891_v18, %v1074_v14  ;;  %v486_v23 = vmul.f32 %v1081_v19, %v466_v16  ;;  %v444_v24 = vpop.f32.mrb[13].mxu1  ;;  %521 = vadd.xlane.f32.xlu0 %v520_v20  ;;  %v626_v10 = vsub.s32 %v1132_v4, %v1135_v7  ;;  %v649_v13 = vadd.s32 4294967264, %v1132_v4 }
 0x1cf   :  { %v445_v25 = vadd.f32 %v1074_v14, %v444_v24  ;;  %v485_v26 = vmul.f32 %v1081_v19, %v465_v17  ;;  %v784_v14 = vld [vmem:[%s1181_s1 + $0x4a] ss:$0 sm:$0xff]  ;;  %v638_v12 = vsub.s32 %v635_v6, %v1135_v7  ;;  %v631_v15 = vsub.s32 %v628_v8, %v1135_v7  ;;  %s945_s1 = smov [#allocation2]  }
 0x1d0   :  { %v468_v27 = vmax.f32 %v450_v21, 0.0  ;;  %v529_v30 = vsel %vm489_vm2, %v486_v23, 0.0  ;;  %v642_v16 = vadd.s32 4294967272, %v1132_v4  ;;  %v652_v21 = vsub.s32 %v649_v13, %v1135_v7  ;;  %s741_s10 = sshll.u32 %s945_s1, 4  ;;  %s742_s10 = int_to_ptr.vmem [resolvable:$true] %s741_s10 }
 0x1d1   :  { %524 = vadd.xlane.f32.xlu1 %v523_v22  ;;  %v467_v28 = vmax.f32 %v445_v25, 0.0  ;;  %v526_v29 = vsel %vm489_vm2, %v485_v26, 0.0  ;;  %v656_v24 = vadd.s32 4294967256, %v1132_v4  ;;  %v663_v26 = vadd.s32 4294967248, %v1132_v4  ;;  %s920_s11 = scalar_lea.vmem %s742_s10, 16  ;;  %s924_s12 = scalar_lea.vmem %s742_s10, 32 }
 0x1d2   :  { %v488_v31 = vmul.f32 %v1081_v19, %v468_v27  ;;  %527 = vadd.xlane.f32.xlu0 %v526_v29  ;;  %v645_v23 = vsub.s32 %v642_v16, %v1135_v7  ;;  %p921_p0 = scmp.ne.s32.totalorder %s742_s10, %s920_s11  ;;  %p925_p1 = scmp.lt.s32.totalorder %s742_s10, %s742_s10 }
 0x1d3   :  { %v487_v32 = vmul.f32 %v1081_v19, %v467_v28  ;;  %p926_p2 = scmp.lt.s32.totalorder %s924_s12, %s920_s11 }
 0x1d4   :  { %v535_v34 = vsel %vm489_vm2, %v488_v31, 0.0  ;;  %v659_v31 = vsub.s32 %v656_v24, %v1135_v7 }
 0x1d5   :  { %530 = vadd.xlane.f32.xlu1 %v529_v30  ;;  %v532_v33 = vsel %vm489_vm2, %v487_v32, 0.0  ;;  %v670_v32 = vadd.s32 4294967240, %v1132_v4  ;;  %p927_p3 = por %p926_p2, %p925_p1 }
 0x1d6   :  { %533 = vadd.xlane.f32.xlu0 %v532_v33 }
 0x1d7   :  { %p928_p4 = pnand %p927_p3, %p921_p0 }
 0x1d9   :  { %536 = vadd.xlane.f32.xlu1 %v535_v34 }
 0x246   :  { %v495_v35 = vpop.xlane.xlu0 %494 }
 0x247   :  { %v543_v36 = vadd.f32 %v784_v14, %v495_v35  ;;  %v677_v35 = vadd.s32 4294967232, %v1132_v4 }
 0x249   :  { %578 = vperm.xlu1 %918, %v543_v36  }
 0x24a   :  { %v501_v37 = vpop.xlane.xlu1 %500  ;;  %v492_v38 = vpop.xlane.xlu0 %491 }
 0x24b   :  { %v545_v39 = vadd.f32 %v784_v14, %v501_v37  ;;  %v542_v40 = vadd.f32 %v784_v14, %v492_v38 }
 0x24d   :  { %584 = vperm.xlu1 %918, %v545_v39   ;;  %575 = vperm.xlu0 %919, %v542_v40   ;;  %v673_v39 = vsub.s32 %v670_v32, %v1135_v7  ;;  %v684_v40 = vadd.s32 4294967224, %v1132_v4 }
 0x24e   :  { %v498_v19 = vpop.xlane.xlu1 %497 }
 0x24f   :  { %v544_v41 = vadd.f32 %v784_v14, %v498_v19  ;;  %v504_v42 = vpop.xlane.xlu0 %503 }
 0x250   :  { %v546_v47 = vadd.f32 %v784_v14, %v504_v42  ;;  %v680_v42 = vsub.s32 %v677_v35, %v1135_v7 }
 0x251   :  { %581 = vperm.xlu1 %918, %v544_v41  }
 0x252   :  { %v507_v43 = vpop.xlane.xlu1 %506 }
 0x253   :  { %v547_v44 = vadd.f32 %v784_v14, %v507_v43  ;;  %v510_v46 = vpop.xlane.xlu0 %509  ;;  %v691_v43 = vadd.s32 4294967216, %v1132_v4 }
 0x254   :  { %v548_v53 = vadd.f32 %v784_v14, %v510_v46 }
 0x255   :  { %590 = vperm.xlu1 %918, %v547_v44  }
 0x256   :  { %v513_v45 = vpop.xlane.xlu1 %512 }
 0x257   :  { %v516_v49 = vpop.xlane.xlu0 %515  ;;  %v549_v50 = vadd.f32 %v784_v14, %v513_v45 }
 0x258   :  { %v550_v57 = vadd.f32 %v784_v14, %v516_v49  ;;  %v698_v49 = vadd.s32 4294967208, %v1132_v4 }
 0x259   :  { %587 = vperm.xlu1 %918, %v546_v47  }
 0x25a   :  { %v519_v48 = vpop.xlane.xlu1 %518 }
 0x25b   :  { %v551_v51 = vadd.f32 %v784_v14, %v519_v48  ;;  %v522_v55 = vpop.xlane.xlu0 %521  ;;  %v687_v48 = vsub.s32 %v684_v40, %v1135_v7 }
 0x25c   :  { %v552_v61 = vadd.f32 %v784_v14, %v522_v55 }
 0x25d   :  { %602 = vperm.xlu0 %919, %v551_v51   ;;  %596 = vperm.xlu1 %918, %v549_v50  }
 0x25e   :  { %v525_v52 = vpop.xlane.xlu1 %524 }
 0x25f   :  { %v553_v54 = vadd.f32 %v784_v14, %v525_v52  ;;  %v528_v60 = vpop.xlane.xlu0 %527  ;;  %v694_v52 = vsub.s32 %v691_v43, %v1135_v7 }
 0x260   :  { %v554_v63 = vadd.f32 %v784_v14, %v528_v60 }
 0x261   :  { %608 = vperm.xlu0 %919, %v553_v54   ;;  %593 = vperm.xlu1 %918, %v548_v53   ;;  %v705_v53 = vadd.s32 4294967200, %v1132_v4 }
 0x262   :  { %v531_v56 = vpop.xlane.xlu1 %530 }
 0x263   :  { %v555_v58 = vadd.f32 %v784_v14, %v531_v56  ;;  %v534_v0 = vpop.xlane.xlu0 %533 }
 0x264   :  { %v556_v1 = vadd.f32 %v784_v14, %v534_v0 }
 0x265   :  { %614 = vperm.xlu0 %919, %v555_v58   ;;  %599 = vperm.xlu1 %918, %v550_v57   ;;  %v701_v57 = vsub.s32 %v698_v49, %v1135_v7  ;;  %v712_v58 = vadd.s32 4294967192, %v1132_v4 }
 0x266   :  { %v537_v59 = vpop.xlane.xlu1 %536 }
 0x267   :  { %v557_v62 = vadd.f32 %v784_v14, %v537_v59  ;;  %v666_v14 = vsub.s32 %v663_v26, %v1135_v7 }
 0x269   :  { %620 = vperm.xlu0 %919, %v557_v62   ;;  %605 = vperm.xlu1 %918, %v552_v61   ;;  %v708_v62 = vsub.s32 %v705_v53, %v1135_v7 }
 0x26d   :  { %611 = vperm.xlu1 %918, %v554_v63   ;;  %v719_v63 = vadd.s32 4294967184, %v1132_v4 }
 0x271   :  { %617 = vperm.xlu1 %918, %v556_v1   ;;  %v726_v1 = vadd.s32 4294967176, %v1132_v4 }
 0x2c8   :  { %v579_v3 = vpop.permute.xlu1 %578 }
 0x2c9   :  { %v632_v22 = vrot.slane %v579_v3, %v631_v15 }
 0x2cc   :  { %v585_v5 = vpop.permute.xlu1 %584  ;;  %v576_v11 = vpop.permute.xlu0 %575 }
 0x2cd   :  { %v627_v18 = vrot.slane %v576_v11, %v626_v10  ;;  %v646_v30 = vrot.slane %v585_v5, %v645_v23  ;;  %v715_v5 = vsub.s32 %v712_v58, %v1135_v7  ;;  %v729_v10 = vsub.s32 %v726_v1, %v1135_v7 }
 0x2cf   :  { %v634_v27 = vsel %vm633_vm3, %v632_v22, %v627_v18 }
 0x2d0   :  { %v582_v9 = vpop.permute.xlu1 %581 }
 0x2d1   :  { %v639_v20 = vrot.slane %v582_v9, %v638_v12  ;;  %v722_v9 = vsub.s32 %v719_v63, %v1135_v7 }
 0x2d3   :  { %v641_v28 = vsel %vm640_vm4, %v639_v20, %v634_v27 }
 0x2d4   :  { %v591_v17 = vpop.permute.xlu1 %590  ;;  %v648_v36 = vsel %vm647_vm5, %v646_v30, %v641_v28 }
 0x2d5   :  { %v660_v38 = vrot.slane %v591_v17, %v659_v31 }
 0x2d8   :  { %v588_v25 = vpop.permute.xlu1 %587 }
 0x2d9   :  { %v653_v29 = vrot.slane %v588_v25, %v652_v21 }
 0x2db   :  { %v655_v37 = vsel %vm654_vm6, %v653_v29, %v648_v36 }
 0x2dc   :  { %v597_v33 = vpop.permute.xlu1 %596  ;;  %v603_v34 = vpop.permute.xlu0 %602  ;;  %v662_v44 = vsel %vm661_vm7, %v660_v38, %v655_v37 }
 0x2dd   :  { %v674_v47 = vrot.slane %v597_v33, %v673_v39  ;;  %v688_v56 = vrot.slane %v603_v34, %v687_v48 }
 0x2e0   :  { %v594_v19 = vpop.permute.xlu1 %593  ;;  %v609_v46 = vpop.permute.xlu0 %608 }
 0x2e1   :  { %v667_v41 = vrot.slane %v594_v19, %v666_v14  ;;  %v702_v3 = vrot.slane %v609_v46, %v701_v57 }
 0x2e3   :  { %v669_v45 = vsel %vm668_vm8, %v667_v41, %v662_v44 }
 0x2e4   :  { %v600_v50 = vpop.permute.xlu1 %599  ;;  %v676_v54 = vsel %vm675_vm9, %v674_v47, %v669_v45  ;;  %v615_v60 = vpop.permute.xlu0 %614 }
 0x2e5   :  { %v681_v51 = vrot.slane %v600_v50, %v680_v42  ;;  %v716_v15 = vrot.slane %v615_v60, %v715_v5 }
 0x2e7   :  { %v683_v55 = vsel %vm682_vm10, %v681_v51, %v676_v54 }
 0x2e8   :  { %v606_v59 = vpop.permute.xlu1 %605  ;;  %v690_v0 = vsel %vm689_vm11, %v688_v56, %v683_v55  ;;  %v621_v12 = vpop.permute.xlu0 %620 }
 0x2e9   :  { %v695_v61 = vrot.slane %v606_v59, %v694_v52  ;;  %v730_v17 = vrot.slane %v621_v12, %v729_v10 }
 0x2eb   :  { %v697_v2 = vsel %vm696_vm12, %v695_v61, %v690_v0 }
 0x2ec   :  { %v612_v6 = vpop.permute.xlu1 %611  ;;  %v704_v11 = vsel %vm703_vm13, %v702_v3, %v697_v2 }
 0x2ed   :  { %v709_v8 = vrot.slane %v612_v6, %v708_v62 }
 0x2ef   :  { %v711_v13 = vsel %vm710_vm14, %v709_v8, %v704_v11 }
 0x2f0   :  { %v618_v16 = vpop.permute.xlu1 %617  ;;  %v718_v18 = vsel %vm717_vm15, %v716_v15, %v711_v13 }
 0x2f1   :  { %v723_v4 = vrot.slane %v618_v16, %v722_v9 }
 0x2f3   :  { %v725_v20 = vsel %vm724_vm0, %v723_v4, %v718_v18 }
 0x2f4   :  { %v732_v21 = vsel %vm731_vm1, %v730_v17, %v725_v20 }
 0x2f5   :  { %734 = vst [vmem:[#allocation2] sm:$0x1] %v732_v21 }
 0x2f6   :  { %931 = shalt.err (!%p928_p4)
}
 0x2f7   :  { %s932_s15 = scalar_lea.hbm %s1182_s2, 16 }
 0x2f8   :  { %p933_p5 = scmp.ne.s32.totalorder %s1182_s2, %s932_s15  ;;  %p936_p6 = scmp.lt.u32.totalorder %s932_s15, %s1182_s2 }
 0x2fa   :  { %p938_p7 = pnand %p936_p6, %p933_p5 }
 0x2fc   :  { %941 = shalt.err (!%p938_p7)
}
 0x2fd   :  { %744 = dma.vmem_to_hbm [thread:$0]  %s742_s10, 16, %s1182_s2, [#allocation3]  }
 0x2fe   :  { %942 = dma.done.wait [#allocation3], 16  }
 0x2ff   :  { %943 = vsyncadd [#allocation3], 4294967280 }
 0x300   :  { %748 = vsyncpa [#allocation3], 1 }

</bundles_post_ra>
